<compile_context>
chip_gen: v7x
topology: tpu7x:2x2x1
jax: 0.10.0
libtpu: 0.0.40
codegen_flags: <defaults>
</compile_context>

<pallas_src>
import jax
import jax.numpy as jnp
from jax import lax
from jax.experimental import pallas as pl
from jax.experimental.pallas import tpu as pltpu


def _down_channel_kernel(x_ref, w_ref, b_ref, o_ref):
    # x_ref: (C, tile_L) channel-major slab of one batch's spatial positions
    # w_ref: (C, C_out) resident weight; b_ref: (1, C_out) f32 resident bias
    # o_ref: (tile_L, C_out)
    # Contract over C (dim 0 of both operands): this fuses the NCHW->token
    # transpose into the MXU feed instead of an extra HBM pass in the wrapper.
    y = lax.dot_general(
        x_ref[...], w_ref[...],
        dimension_numbers=(((0,), (0,)), ((), ())),
        preferred_element_type=jnp.float32,
    )
    y = y + b_ref[...].astype(jnp.float32)
    o_ref[...] = y.astype(o_ref.dtype)


def _vmem_limit_bytes():
    """Generation-aware scoped-VMEM limit (v5e/v6e: 128 MiB phys, v7x: 64 MiB)."""
    cap = None
    try:
        info = pltpu.get_tpu_info()
        cap = getattr(info, "vmem_capacity_bytes", None)
    except Exception:
        cap = None
    if not cap or cap <= 0:
        cap = 64 * 1024 * 1024  # v7x-safe assumption when the query is unavailable
    return int(min(cap * 3 // 4, 112 * 1024 * 1024))


def _pick_tile_l(L, C, C_out, itemsize, vmem_limit, B):
    """Spatial tile length: multiple of 128, sized from a VMEM byte budget.

    Used with a cdiv grid, so it never falls back to a full-extent (M, C)
    block and never requires L % tile == 0."""
    if L <= 128:
        return L  # full-extent minor block is always legal
    w_bytes = C * C_out * itemsize
    # 2x double-buffered x tiles + ~2x output tiles ~ 3 "x-budget" units,
    # plus the (double-buffered) resident weight and some slack.
    avail = max(vmem_limit - 2 * w_bytes - (1 << 20), 3 * C * 128 * itemsize)
    x_budget = min(8 << 20, avail // 3)            # bytes per x buffer
    tile = max(128, (x_budget // (C * itemsize)) // 128 * 128)
    tile = min(tile, max(128, (L // 128) * 128))   # don't exceed (128-floor of) L
    # Keep a few grid steps so megacore / v7x dual-TC can balance the grid.
    while B * ((L + tile - 1) // tile) < 4 and tile >= 512:
        tile = max(256, (tile // 2) // 128 * 128)
    return tile


def down_channel(x_nchw, weight, bias, *, tile_l=None):
    """x_nchw: [B, C, H, W]; weight: [C//2, C] (nn.Linear layout out_feat, in_feat);
    bias: [C//2]. Returns [B, C//2, H, W] with the exact Down_channel semantics."""
    B, C, H, W = x_nchw.shape
    C_out, C_in = weight.shape
    assert C_in == C and bias.shape == (C_out,)
    L = H * W

    # Free row-major view of x (no data movement); tiny one-time weight prep.
    x_bcl = x_nchw.reshape(B, C, L)
    w_t = jnp.transpose(weight).astype(x_nchw.dtype)   # (C, C_out), y = x @ W.T
    b2 = bias.reshape(1, C_out).astype(jnp.float32)    # bias stays f32

    itemsize = jnp.dtype(x_nchw.dtype).itemsize
    vmem_limit = _vmem_limit_bytes()
    if tile_l is None:
        tile_l = _pick_tile_l(L, C, C_out, itemsize, vmem_limit, B)
    n_l = pl.cdiv(L, tile_l)

    flops = 2 * B * L * C * C_out
    bytes_accessed = (B * L * C * itemsize          # x read (exactly once)
                      + C * C_out * itemsize        # resident weight
                      + C_out * 4                   # bias
                      + B * L * C_out * itemsize)   # output write

    out3d = pl.pallas_call(
        _down_channel_kernel,
        out_shape=jax.ShapeDtypeStruct((B, L, C_out), x_nchw.dtype),
        grid_spec=pltpu.PrefetchScalarGridSpec(
            num_scalar_prefetch=0,
            grid=(B, n_l),
            in_specs=[
                # channel-major slab of one batch; transpose happens in the dot
                pl.BlockSpec((pl.Squeezed(), C, tile_l), lambda b, l: (b, 0, l)),
                pl.BlockSpec((C, C_out), lambda b, l: (0, 0)),   # resident weight
                pl.BlockSpec((1, C_out), lambda b, l: (0, 0)),   # resident bias
            ],
            out_specs=pl.BlockSpec((pl.Squeezed(), tile_l, C_out),
                                   lambda b, l: (b, l, 0)),
        ),
        compiler_params=pltpu.CompilerParams(
            dimension_semantics=("parallel", "parallel"),
            vmem_limit_bytes=vmem_limit,
        ),
        cost_estimate=pl.CostEstimate(
            flops=flops, transcendentals=0, bytes_accessed=bytes_accessed),
    )(x_bcl, w_t, b2)

    # torch: y.view(B, C//2, H, W) over the contiguous [B*H*W, C//2] buffer; the
    # [B, L, C_out] result has identical row-major memory, so this reshape is a
    # free reinterpretation (reproduces the module's own interleave quirk).
    return out3d.reshape(B, C_out, H, W)


def reference(x_nchw, weight, bias):
    """Pure-JAX transcription of the PyTorch forward, for verification."""
    B, C, H, W = x_nchw.shape
    x = jnp.transpose(x_nchw.reshape(B, C, H * W), (1, 0, 2))   # [C, B, L]
    x = jnp.transpose(x.reshape(C, B * H * W), (1, 0))          # [B*L, C]
    y = x @ weight.T + bias                                     # [B*L, C//2]
    return y.reshape(B, C // 2, H, W)


if __name__ == "__main__":
    # Small shapes consistent with the module (in_ch -> in_ch // 2).
    B, C, H, W = 2, 64, 16, 16

    key = jax.random.PRNGKey(0)
    kx, kw, kb = jax.random.split(key, 3)
    x = jax.random.normal(kx, (B, C, H, W), dtype=jnp.float32)
    weight = 0.05 * jax.random.normal(kw, (C // 2, C), dtype=jnp.float32)
    bias = 0.05 * jax.random.normal(kb, (C // 2,), dtype=jnp.float32)

    out = jax.block_until_ready(down_channel(x, weight, bias))
    ref = jax.block_until_ready(reference(x, weight, bias))

    assert out.shape == (B, C // 2, H, W), out.shape
    max_err = float(jnp.max(jnp.abs(out - ref)))
    assert jnp.allclose(out, ref, atol=1e-3, rtol=1e-3), max_err

    print("KERNEL_OK")
</pallas_src>

<mosaic_0001>
module attributes {stable_mosaic.version = 11 : i64} {
  func.func @_down_channel_kernel(%arg0: i32, %arg1: i32, %arg2: memref<1x64x256xf32, #tpu.memory_space<vmem>>, %arg3: memref<64x32xf32, #tpu.memory_space<vmem>>, %arg4: memref<1x32xf32, #tpu.memory_space<vmem>>, %arg5: memref<1x256x32xf32, #tpu.memory_space<vmem>>) attributes {dimension_semantics = [#tpu.dimension_semantics<parallel>, #tpu.dimension_semantics<parallel>], iteration_bounds = array<i64: 2, 1>, scalar_prefetch = 0 : i64, scratch_operands = 0 : i64, tpu.core_type = #tpu.core_type<tc>, window_params = [{transform_indices = @transform_0, window_bounds = array<i64: 1, 64, 256>}, {pipeline_mode = #tpu.pipeline_mode<synchronous>, transform_indices = @transform_1, window_bounds = array<i64: 64, 32>}, {pipeline_mode = #tpu.pipeline_mode<synchronous>, transform_indices = @transform_2, window_bounds = array<i64: 1, 32>}, {transform_indices = @transform_3, window_bounds = array<i64: 1, 256, 32>}]} {
    %c0 = arith.constant 0 : index
    %c0_0 = arith.constant 0 : index
    %c0_1 = arith.constant 0 : index
    %0 = vector.load %arg2[%c0, %c0_0, %c0_1] : memref<1x64x256xf32, #tpu.memory_space<vmem>>, vector<1x64x256xf32>
    %1 = vector.shape_cast %0 : vector<1x64x256xf32> to vector<64x256xf32>
    %c0_2 = arith.constant 0 : index
    %c0_3 = arith.constant 0 : index
    %2 = vector.load %arg3[%c0_2, %c0_3] : memref<64x32xf32, #tpu.memory_space<vmem>>, vector<64x32xf32>
    %cst = arith.constant dense<0.000000e+00> : vector<256x32xf32>
    %3 = tpu.matmul %1, %2, %cst {dimension_numbers = #tpu.dot_dimension_numbers<[0], [0], [1], [1], [0, 1, 1, 1], [], []>} : vector<64x256xf32>, vector<64x32xf32>, vector<256x32xf32> -> vector<256x32xf32>
    %c0_4 = arith.constant 0 : index
    %c0_5 = arith.constant 0 : index
    %4 = vector.load %arg4[%c0_4, %c0_5] : memref<1x32xf32, #tpu.memory_space<vmem>>, vector<1x32xf32>
    %5 = vector.broadcast %4 : vector<1x32xf32> to vector<256x32xf32>
    %6 = arith.addf %3, %5 : vector<256x32xf32>
    %c0_6 = arith.constant 0 : index
    %c0_7 = arith.constant 0 : index
    %c0_8 = arith.constant 0 : index
    %7 = vector.load %arg5[%c0_6, %c0_7, %c0_8] : memref<1x256x32xf32, #tpu.memory_space<vmem>>, vector<1x256x32xf32>
    %8 = vector.shape_cast %7 : vector<1x256x32xf32> to vector<256x32xf32>
    %9 = vector.shape_cast %6 : vector<256x32xf32> to vector<1x256x32xf32>
    tpu.vector_store %arg5[%c0_6, %c0_7, %c0_8], %9 {strides = array<i32>} : memref<1x256x32xf32, #tpu.memory_space<vmem>>, vector<1x256x32xf32>,
    return
  }
  func.func @transform_0(%arg0: i32, %arg1: i32) -> (i32, i32, i32) {
    %c0_i32 = arith.constant 0 : i32
    %c0_i32_0 = arith.constant 0 : i32
    return %arg0, %c0_i32, %arg1 : i32, i32, i32
  }
  func.func @transform_1(%arg0: i32, %arg1: i32) -> (i32, i32) {
    %c0_i32 = arith.constant 0 : i32
    %c0_i32_0 = arith.constant 0 : i32
    %c0_i32_1 = arith.constant 0 : i32
    return %c0_i32, %c0_i32_0 : i32, i32
  }
  func.func @transform_2(%arg0: i32, %arg1: i32) -> (i32, i32) {
    %c0_i32 = arith.constant 0 : i32
    %c0_i32_0 = arith.constant 0 : i32
    %c0_i32_1 = arith.constant 0 : i32
    return %c0_i32, %c0_i32_0 : i32, i32
  }
  func.func @transform_3(%arg0: i32, %arg1: i32) -> (i32, i32, i32) {
    %c0_i32 = arith.constant 0 : i32
    %c0_i32_0 = arith.constant 0 : i32
    return %arg0, %arg1, %c0_i32 : i32, i32, i32
  }
}

</mosaic_0001>

<bundles_post_ra>
// kernel: tpu_custom_call.1
= control target key start
LH: loop header
LB: loop body
LE: loop exit
PB: predicated region body
PF: predicated region fallthrough
CT: control target
= control target key end

     0   :  { %8 = vsyncpa [#allocation3], 0  ;;  %s1404_s0 = inlined_call_operand.hbm [shape: f32[2,64,256], index: 0, kind: input, shape index: {}]   ;;  %s1405_s1 = inlined_call_operand.vmem [shape: f32[64,32], index: 1, kind: input, shape index: {}]   ;;  %s1406_s2 = inlined_call_operand.vmem [shape: f32[1,32], index: 2, kind: input, shape index: {}]   ;;  %s1407_s3 = inlined_call_operand.vmem [shape: f32[2,256,32], index: 3, kind: output, shape index: {}]  }
   0x1   :  { %10 = vsyncpa [#allocation3 + $0x1], 0  ;;  %s1103_s12 = smov 0   ;;  %s1105_s13 = smov 0  }
   0x2   :  { %s1107_s14 = smov 0   ;;  %s1109_s15 = smov 0  }
   0x3   :  { %s1111_s16 = smov 0   ;;  %s1113_s17 = smov 0  }
   0x4 LB: > { %s764_s18 = sadd.s32 4294967295, %s1078_s17   ;;  %s28_s19 = sadd.s32 1, %s1074_s16  ;;  %s1078_s17 = sphi %s1113_s17, %s16_s17   ;;  %s1074_s16 = sphi %s1111_s16, %s1415_s16   ;;  %s1070_s15 = sphi %s1109_s15, %s1414_s15   ;;  %s1066_s14 = sphi %s1107_s14, %s1413_s14   ;;  %s1062_s13 = sphi %s1105_s13, %s1412_s13   ;;  %s1058_s12 = sphi %s1103_s12, %s1411_s12  }
   0x5   : > { %p30_p0 = scmp.ge.s32.totalorder %s28_s19, 2  ;;  %s37_s20 = sadd.s32 1, %s1066_s14 }
   0x6   : > { %p44_p1 = scmp.ne.s32.totalorder %s1066_s14, %s1062_s13  ;;  %p45_p2 = scmp.eq.s32.totalorder %s1078_s17, 0 }
   0x7   : > { %s1417_s19 = smov (%p30_p0, %s28_s19), 0  ;;  %p50_p4 = scmp.ne.s32.totalorder %s1062_s13, %s1058_s12 }
   0x8   : > { %p1139_p3 = por %p45_p2, %p44_p1  ;;  %s32_s22 = ssub.s32 %s1074_s16, %s1417_s19 }
   0x9   : > { %p51_p5 = scmp.eq.s32.totalorder %s764_s18, 0  ;;  %p35_p6 = scmp.eq.s32.totalorder %s32_s22, 0 }
   0xa   : > { %p946_p8 = scmp.lt.s32.totalorder %s1078_s17, 2  ;;  %s150_s25 = sand.u32 1, %s1066_s14  }
   0xb   : > { %p1146_p7 = por %p51_p5, %p50_p4  ;;  %s810_s26 = sshll.u32 %s1074_s16, 11 }
   0xc   : > { %s1152_s24 = scalar_select %p35_p6, %s1066_s14, %s37_s20  }
   0xd   : > { %s768_s27 = sshll.u32 %s150_s25, 7  ;;  %s1159_s30 = scalar_lea.hbm %s1404_s0, %s810_s26 }
   0xe   : > { %s154_s4 = scalar_lea.vmem [#allocation2], %s768_s27  ;;  %p1163_p9 = pnand %p946_p8, %p1139_p3 }
   0xf   : > { %s163_s5 = sshll.u32 %s154_s4, 4  ;;  %s1169_s7 = scalar_lea.sflag [#allocation3], %s150_s25  ;;  %s1167_s5 = int_to_ptr.vmem [resolvable:$true] %s163_s5 }
  0x10   : > { %s998_s8 = scalar_lea.hbm %s1159_s30, 2048  ;;  %p1000_p11 = pneg %p1163_p9 }
  0x11   : > { %p999_p10 = scmp.ne.s32.totalorder %s1159_s30, %s998_s8  ;;  %s1003_s11 = scalar_lea.hbm %s1404_s0, 4096 }
  0x12   : > { %p1004_p0 = scmp.lt.u32.totalorder %s1159_s30, %s1404_s0  ;;  %p1005_p1 = scmp.lt.u32.totalorder %s1003_s11, %s998_s8 }
  0x13   : > { %p1001_p12 = pnand %p1000_p11, %p999_p10  ;;  %p1007_p3 = scmp.lt.u32.totalorder %s998_s8, %s1159_s30 }
  0x14   : > { %p1006_p2 = por %p1005_p1, %p1004_p0 }
  0x15   : > { %p1002_p13 = pneg %p1001_p12 }
  0x16   : > { %p1008_p4 = por %p1007_p3, %p1006_p2 }
  0x18   : > { %p1009_p5 = pnand %p1008_p4, %p1002_p13 }
  0x1a   : > { %1012 = shalt.err (!%p1009_p5)
}
  0x1b   : > { %s1013_s20 = scalar_lea.vmem %s1167_s5, 2048  ;;  %s1080_s21 = smov [#allocation2]  }
  0x1c   : > { %p1014_p6 = scmp.ne.s32.totalorder %s1167_s5, %s1013_s20  ;;  %s1018_s22 = sshll.u32 %s1080_s21, 4  ;;  %s1019_s22 = int_to_ptr.vmem [resolvable:$false] %s1018_s22 }
  0x1d   : > { %s1020_s25 = scalar_lea.vmem %s1019_s22, 4096  ;;  %p1021_p12 = scmp.lt.s32.totalorder %s1167_s5, %s1019_s22 }
  0x1e   : > { %p1016_p8 = pnand %p1014_p6, %p1000_p11  ;;  %p1022_p0 = scmp.lt.s32.totalorder %s1020_s25, %s1013_s20 }
  0x20   : > { %p1017_p10 = pneg %p1016_p8  ;;  %p1023_p1 = por %p1022_p0, %p1021_p12 }
  0x22   : > { %p1024_p2 = pnand %p1023_p1, %p1017_p10 }
  0x24   : > { %1027 = shalt.err (!%p1024_p2)
}
  0x25   : > { %s1081_s26 = smov 256   ;;  %s1082_s27 = smov 16  }
  0x26   : > { %945 = dma.hbm_to_vmem [thread:$0]  (!%p1163_p9), %s1159_s30, 2048, %s1167_s5, %s1169_s7, %s1081_s26, %s1081_s26, %s1082_s27  }
  0x27   : > { %p771_p11 = scmp.ge.s32.totalorder %s1078_s17, 1  ;;  %p171_p13 = scmp.lt.s32.totalorder %s1078_s17, 3 }
  0x29   : > { %p172_p3 = pnand %p771_p11, %p171_p13 }
  0x2a   : > { %s177_s28 = sand.u32 (!%p172_p3), 1, %s1062_s13  }
  0x2b   : > { %175 = sbr.rel (%p172_p3) target bundleno = 457 (0x1c9), region = 32  ;;  %s772_s29 = sshll.u32 (!%p172_p3), %s177_s28, 7 }
  0x2c   : > { %s178_s4 = scalar_lea.sflag (!%p172_p3), [#allocation3], %s177_s28  ;;  %s1200_s8 = scalar_lea.vmem (!%p172_p3), [#allocation2], %s772_s29 }
  0x32   : > { %1053 = dma.done.wait (%p1146_p7), %s178_s4, 2048  }
  0x33   : > { %1055 = vsyncadd (%p1146_p7), %s178_s4, 4294965248  ;;  %v220_v0 = vld [vmem:[%s1200_s8 + $0x8] sm:$0xff]  ;;  %v219_v1 = vld [vmem:[%s1200_s8] sm:$0xff]  ;;  %vm314_vm0 = vcmask 523264   ;;  %p210_p7 = scmp.lt.s32.totalorder %s1070_s15, 1  ;;  %vm636_vm1 = vcmask 261120  }
  0x34   : > { %282 = vxpose.xlu1.b32.start [1/8] (short) %v220_v0, 128  ;;  %250 = vxpose.xlu0.b32.start [1/8] (short) %v219_v1, 128  ;;  %v222_v2 = vld [vmem:[%s1200_s8 + $0x18] sm:$0xff]  ;;  %v221_v3 = vld [vmem:[%s1200_s8 + $0x10] sm:$0xff]  ;;  %v224_v4 = vld [vmem:[%s1200_s8 + $0x28] sm:$0xff] }
  0x35   : > { %v235_v5 = vld [vmem:[%s1405_s1] sm:$0xff]  ;;  %v236_v6 = vld [vmem:[%s1405_s1 + $0x8] sm:$0xff]  ;;  %v237_v9 = vld [vmem:[%s1405_s1 + $0x10] sm:$0xff]  ;;  %s1419_s15 = smov (!%p210_p7, %s1070_s15), 1 }
  0x36   : > { %v223_v7 = vld [vmem:[%s1200_s8 + $0x20] sm:$0xff]  ;;  %v916_v8 = vpack.c.bf16 %v236_v6, %v235_v5  ;;  %v238_v10 = vld [vmem:[%s1405_s1 + $0x18] sm:$0xff]  ;;  %v240_v13 = vld [vmem:[%s1405_s1 + $0x28] sm:$0xff]  ;;  %s811_s28 = sshll.u32 %s1419_s15, 8 }
  0x37   : > { %v920_v11 = vpack.c.bf16 %v238_v10, %v237_v9  ;;  %v239_v12 = vld [vmem:[%s1405_s1 + $0x20] sm:$0xff]  ;;  %v226_v14 = vld [vmem:[%s1200_s8 + $0x38] sm:$0xff]  ;;  %v225_v15 = vld [vmem:[%s1200_s8 + $0x30] sm:$0xff]  ;;  %s1288_s23 = scalar_lea.vmem %s1407_s3, %s811_s28 }
  0x38   : > { %283 = vxpose.xlu1.b32.cont [2/8] (short) %v222_v2, 128  ;;  %251 = vxpose.xlu0.b32.cont [2/8] (short) %v221_v3, 128  ;;  %v924_v16 = vpack.c.bf16 %v240_v13, %v239_v12  ;;  %v241_v17 = vld [vmem:[%s1405_s1 + $0x30] sm:$0xff]  ;;  %v242_v18 = vld [vmem:[%s1405_s1 + $0x38] sm:$0xff]  ;;  %v228_v19 = vld [vmem:[%s1200_s8 + $0x48] sm:$0xff] }
  0x39   : > { %917 = vmatprep.subr.bf16.mxu0 %v916_v8  ;;  %932 = vmatprep.subr.bf16.mxu1 %v916_v8  ;;  %v227_v20 = vld [vmem:[%s1200_s8 + $0x40] sm:$0xff]  ;;  %v928_v21 = vpack.c.bf16 %v242_v18, %v241_v17  ;;  %v230_v22 = vld [vmem:[%s1200_s8 + $0x58] sm:$0xff]  ;;  %v229_v23 = vld [vmem:[%s1200_s8 + $0x50] sm:$0xff] }
  0x3a   : > { %919 = vmatpush3.bf16.msra.mxu0 %v916_v8  ;;  %936 = vmatpush3.bf16.msra.mxu1 %v916_v8  ;;  %v232_v24 = vld [vmem:[%s1200_s8 + $0x68] sm:$0xff]  ;;  %v231_v25 = vld [vmem:[%s1200_s8 + $0x60] sm:$0xff]  ;;  %v234_v26 = vld [vmem:[%s1200_s8 + $0x78] sm:$0xff] }
  0x3b   : > { %921 = vmatprep.subr.bf16.mxu0 %v920_v11  ;;  %933 = vmatprep.subr.bf16.mxu1 %v920_v11  ;;  %v233_v27 = vld [vmem:[%s1200_s8 + $0x70] sm:$0xff]  ;;  %v1283_v60 = vld [vmem:[%s1406_s2] ss:$0 sm:$0xff] }
  0x3c   : > { %284 = vxpose.xlu1.b32.cont [3/8] (short) %v224_v4, 128  ;;  %252 = vxpose.xlu0.b32.cont [3/8] (short) %v223_v7, 128 }
  0x3e   : > { %923 = vmatpush3.bf16.msra.mxu0 %v920_v11  ;;  %937 = vmatpush3.bf16.msra.mxu1 %v920_v11 }
  0x3f   : > { %925 = vmatprep.subr.bf16.mxu0 %v924_v16  ;;  %934 = vmatprep.subr.bf16.mxu1 %v924_v16 }
  0x40   : > { %285 = vxpose.xlu1.b32.cont [4/8] (short) %v226_v14, 128  ;;  %253 = vxpose.xlu0.b32.cont [4/8] (short) %v225_v15, 128 }
  0x42   : > { %927 = vmatpush3.bf16.msra.mxu0 %v924_v16  ;;  %938 = vmatpush3.bf16.msra.mxu1 %v924_v16 }
  0x43   : > { %929 = vmatprep.subr.bf16.mxu0 %v928_v21  ;;  %935 = vmatprep.subr.bf16.mxu1 %v928_v21 }
  0x44   : > { %286 = vxpose.xlu1.b32.cont [5/8] (short) %v228_v19, 128  ;;  %254 = vxpose.xlu0.b32.cont [5/8] (short) %v227_v20, 128 }
  0x46   : > { %931 = vmatpush3.bf16.msra.mxu0 %v928_v21  ;;  %939 = vmatpush3.bf16.msra.mxu1 %v928_v21 }
  0x48   : > { %287 = vxpose.xlu1.b32.cont [6/8] (short) %v230_v22, 128  ;;  %255 = vxpose.xlu0.b32.cont [6/8] (short) %v229_v23, 128 }
  0x4c   : > { %288 = vxpose.xlu1.b32.cont [7/8] (short) %v232_v24, 128  ;;  %256 = vxpose.xlu0.b32.cont [7/8] (short) %v231_v25, 128 }
  0x50   : > { %289 = vxpose.xlu1.b32.end [8/8] (short) %v234_v26, 128  ;;  %257 = vxpose.xlu0.b32.end [8/8] (short) %v233_v27, 128 }
  0xb4   : > { %v298_v28 = vpop.trf.xlu1  ;;  %v266_v29 = vpop.trf.xlu0 }
  0xb5   : > { %868 = vmatprep.mubr.msk.f32.mxu0 %vm314_vm0, %v266_v29  ;;  %892 = vmatprep.mubr.msk.f32.mxu1 %vm314_vm0, %v298_v28 }
  0xb8   : > { %v299_v30 = vpop.trf.xlu1  ;;  %v267_v31 = vpop.trf.xlu0 }
  0xb9   : > { %869 = vmatmul.mubr.msk.f32.vlgmr.msra.gmra.mrb[0].mxu0 %vm314_vm0, %v267_v31  ;;  %893 = vmatmul.mubr.msk.f32.vlgmr.msra.gmra.mrb[0].mxu1 %vm314_vm0, %v299_v30 }
  0xbc   : > { %v300_v32 = vpop.trf.xlu1  ;;  %v268_v33 = vpop.trf.xlu0 }
  0xbd   : > { %871 = vmatprep.mubr.msk.f32.mxu0 %vm314_vm0, %v268_v33  ;;  %895 = vmatprep.mubr.msk.f32.mxu1 %vm314_vm0, %v300_v32 }
  0xc0   : > { %v301_v34 = vpop.trf.xlu1  ;;  %v269_v35 = vpop.trf.xlu0 }
  0xc1   : > { %872 = vmatmul.mubr.msk.f32.gmra.mrb[2].mxu0 %vm314_vm0, %v269_v35  ;;  %896 = vmatmul.mubr.msk.f32.gmra.mrb[2].mxu1 %vm314_vm0, %v301_v34 }
  0xc4   : > { %v302_v36 = vpop.trf.xlu1  ;;  %v270_v37 = vpop.trf.xlu0 }
  0xc5   : > { %874 = vmatprep.mubr.msk.f32.mxu0 %vm314_vm0, %v270_v37  ;;  %898 = vmatprep.mubr.msk.f32.mxu1 %vm314_vm0, %v302_v36 }
  0xc8   : > { %v303_v38 = vpop.trf.xlu1  ;;  %v271_v39 = vpop.trf.xlu0 }
  0xc9   : > { %875 = vmatmul.mubr.msk.f32.gmra.mrb[4].mxu0 %vm314_vm0, %v271_v39  ;;  %899 = vmatmul.mubr.msk.f32.gmra.mrb[4].mxu1 %vm314_vm0, %v303_v38 }
  0xcc   : > { %v304_v40 = vpop.trf.xlu1  ;;  %v272_v41 = vpop.trf.xlu0 }
  0xcd   : > { %877 = vmatprep.mubr.msk.f32.mxu0 %vm314_vm0, %v272_v41  ;;  %901 = vmatprep.mubr.msk.f32.mxu1 %vm314_vm0, %v304_v40 }
  0xd0   : > { %v305_v42 = vpop.trf.xlu1  ;;  %v273_v43 = vpop.trf.xlu0 }
  0xd1   : > { %878 = vmatmul.mubr.msk.f32.gmra.mrb[6].mxu0 %vm314_vm0, %v273_v43  ;;  %902 = vmatmul.mubr.msk.f32.gmra.mrb[6].mxu1 %vm314_vm0, %v305_v42 }
  0xd4   : > { %v306_v44 = vpop.trf.xlu1  ;;  %v274_v45 = vpop.trf.xlu0 }
  0xd5   : > { %880 = vmatprep.mubr.msk.f32.mxu0 %vm314_vm0, %v274_v45  ;;  %904 = vmatprep.mubr.msk.f32.mxu1 %vm314_vm0, %v306_v44 }
  0xd8   : > { %v307_v46 = vpop.trf.xlu1  ;;  %v275_v47 = vpop.trf.xlu0 }
  0xd9   : > { %881 = vmatmul.mubr.msk.f32.gmra.mrb[8].mxu0 %vm314_vm0, %v275_v47  ;;  %905 = vmatmul.mubr.msk.f32.gmra.mrb[8].mxu1 %vm314_vm0, %v307_v46 }
  0xdc   : > { %v308_v48 = vpop.trf.xlu1  ;;  %v276_v49 = vpop.trf.xlu0 }
  0xdd   : > { %883 = vmatprep.mubr.msk.f32.mxu0 %vm314_vm0, %v276_v49  ;;  %907 = vmatprep.mubr.msk.f32.mxu1 %vm314_vm0, %v308_v48 }
  0xe0   : > { %v309_v50 = vpop.trf.xlu1  ;;  %v277_v51 = vpop.trf.xlu0 }
  0xe1   : > { %884 = vmatmul.mubr.msk.f32.gmra.mrb[10].mxu0 %vm314_vm0, %v277_v51  ;;  %908 = vmatmul.mubr.msk.f32.gmra.mrb[10].mxu1 %vm314_vm0, %v309_v50 }
  0xe4   : > { %v310_v52 = vpop.trf.xlu1  ;;  %v278_v53 = vpop.trf.xlu0 }
  0xe5   : > { %886 = vmatprep.mubr.msk.f32.mxu0 %vm314_vm0, %v278_v53  ;;  %910 = vmatprep.mubr.msk.f32.mxu1 %vm314_vm0, %v310_v52 }
  0xe8   : > { %v311_v54 = vpop.trf.xlu1  ;;  %v279_v55 = vpop.trf.xlu0 }
  0xe9   : > { %887 = vmatmul.mubr.msk.f32.gmra.mrb[12].mxu0 %vm314_vm0, %v279_v55  ;;  %911 = vmatmul.mubr.msk.f32.gmra.mrb[12].mxu1 %vm314_vm0, %v311_v54 }
  0xec   : > { %v312_v56 = vpop.trf.xlu1  ;;  %v280_v57 = vpop.trf.xlu0 }
  0xed   : > { %889 = vmatprep.mubr.msk.f32.mxu0 %vm314_vm0, %v280_v57  ;;  %913 = vmatprep.mubr.msk.f32.mxu1 %vm314_vm0, %v312_v56 }
  0xf0   : > { %v313_v58 = vpop.trf.xlu1  ;;  %v281_v59 = vpop.trf.xlu0 }
  0xf1   : > { %890 = vmatmul.mubr.msk.f32.gmra.mrb[14].mxu0 %vm314_vm0, %v281_v59  ;;  %914 = vmatmul.mubr.msk.f32.gmra.mrb[14].mxu1 %vm314_vm0, %v313_v58 }
 0x18c   : > { %v870_v61 = vpop.f32.mrb[0].mxu0  ;;  %v894_v62 = vpop.f32.mrb[0].mxu1 }
 0x18d   : > { %v483_v63 = vadd.f32 %v870_v61, %v1283_v60  ;;  %v563_v0 = vadd.f32 %v894_v62, %v1283_v60  ;;  %v477_v1 = vpop.f32.mrb[1].mxu0  ;;  %v557_v2 = vpop.f32.mrb[1].mxu1 }
 0x18e   : > { %v478_v3 = vadd.f32 %v1283_v60, %v477_v1  ;;  %v558_v4 = vadd.f32 %v1283_v60, %v557_v2 }
 0x18f   : > { %638 = vst.msk [vmem:[%s1288_s23 + $0x8] sm:$0xff] %vm636_vm1, %v483_v63  ;;  %654 = vst.msk [vmem:[%s1288_s23 + $0x88] sm:$0xff] %vm636_vm1, %v563_v0 }
 0x190   : > { %637 = vst.msk [vmem:[%s1288_s23] sm:$0xff] %vm636_vm1, %v478_v3  ;;  %653 = vst.msk [vmem:[%s1288_s23 + $0x80] sm:$0xff] %vm636_vm1, %v558_v4 }
 0x194   : > { %v873_v5 = vpop.f32.mrb[2].mxu0  ;;  %v897_v6 = vpop.f32.mrb[2].mxu1 }
 0x195   : > { %v493_v7 = vadd.f32 %v873_v5, %v1283_v60  ;;  %v573_v8 = vadd.f32 %v897_v6, %v1283_v60  ;;  %v487_v9 = vpop.f32.mrb[3].mxu0  ;;  %v567_v10 = vpop.f32.mrb[3].mxu1 }
 0x196   : > { %v488_v11 = vadd.f32 %v1283_v60, %v487_v9  ;;  %v568_v12 = vadd.f32 %v1283_v60, %v567_v10 }
 0x197   : > { %640 = vst.msk [vmem:[%s1288_s23 + $0x18] sm:$0xff] %vm636_vm1, %v493_v7  ;;  %656 = vst.msk [vmem:[%s1288_s23 + $0x98] sm:$0xff] %vm636_vm1, %v573_v8 }
 0x198   : > { %639 = vst.msk [vmem:[%s1288_s23 + $0x10] sm:$0xff] %vm636_vm1, %v488_v11  ;;  %655 = vst.msk [vmem:[%s1288_s23 + $0x90] sm:$0xff] %vm636_vm1, %v568_v12 }
 0x19c   : > { %v876_v13 = vpop.f32.mrb[4].mxu0  ;;  %v900_v14 = vpop.f32.mrb[4].mxu1 }
 0x19d   : > { %v503_v15 = vadd.f32 %v876_v13, %v1283_v60  ;;  %v583_v16 = vadd.f32 %v900_v14, %v1283_v60  ;;  %v497_v17 = vpop.f32.mrb[5].mxu0  ;;  %v577_v18 = vpop.f32.mrb[5].mxu1 }
 0x19e   : > { %v498_v19 = vadd.f32 %v1283_v60, %v497_v17  ;;  %v578_v20 = vadd.f32 %v1283_v60, %v577_v18 }
 0x19f   : > { %642 = vst.msk [vmem:[%s1288_s23 + $0x28] sm:$0xff] %vm636_vm1, %v503_v15  ;;  %658 = vst.msk [vmem:[%s1288_s23 + $0xa8] sm:$0xff] %vm636_vm1, %v583_v16 }
 0x1a0   : > { %641 = vst.msk [vmem:[%s1288_s23 + $0x20] sm:$0xff] %vm636_vm1, %v498_v19  ;;  %657 = vst.msk [vmem:[%s1288_s23 + $0xa0] sm:$0xff] %vm636_vm1, %v578_v20 }
 0x1a4   : > { %v879_v21 = vpop.f32.mrb[6].mxu0  ;;  %v903_v22 = vpop.f32.mrb[6].mxu1 }
 0x1a5   : > { %v513_v23 = vadd.f32 %v879_v21, %v1283_v60  ;;  %v593_v24 = vadd.f32 %v903_v22, %v1283_v60  ;;  %v507_v25 = vpop.f32.mrb[7].mxu0  ;;  %v587_v26 = vpop.f32.mrb[7].mxu1 }
 0x1a6   : > { %v508_v27 = vadd.f32 %v1283_v60, %v507_v25  ;;  %v588_v28 = vadd.f32 %v1283_v60, %v587_v26 }
 0x1a7   : > { %644 = vst.msk [vmem:[%s1288_s23 + $0x38] sm:$0xff] %vm636_vm1, %v513_v23  ;;  %660 = vst.msk [vmem:[%s1288_s23 + $0xb8] sm:$0xff] %vm636_vm1, %v593_v24 }
 0x1a8   : > { %643 = vst.msk [vmem:[%s1288_s23 + $0x30] sm:$0xff] %vm636_vm1, %v508_v27  ;;  %659 = vst.msk [vmem:[%s1288_s23 + $0xb0] sm:$0xff] %vm636_vm1, %v588_v28 }
 0x1ac   : > { %v882_v29 = vpop.f32.mrb[8].mxu0  ;;  %v906_v30 = vpop.f32.mrb[8].mxu1 }
 0x1ad   : > { %v523_v31 = vadd.f32 %v882_v29, %v1283_v60  ;;  %v603_v32 = vadd.f32 %v906_v30, %v1283_v60  ;;  %v517_v33 = vpop.f32.mrb[9].mxu0  ;;  %v597_v34 = vpop.f32.mrb[9].mxu1 }
 0x1ae   : > { %v518_v35 = vadd.f32 %v1283_v60, %v517_v33  ;;  %v598_v36 = vadd.f32 %v1283_v60, %v597_v34 }
 0x1af   : > { %646 = vst.msk [vmem:[%s1288_s23 + $0x48] sm:$0xff] %vm636_vm1, %v523_v31  ;;  %662 = vst.msk [vmem:[%s1288_s23 + $0xc8] sm:$0xff] %vm636_vm1, %v603_v32 }
 0x1b0   : > { %645 = vst.msk [vmem:[%s1288_s23 + $0x40] sm:$0xff] %vm636_vm1, %v518_v35  ;;  %661 = vst.msk [vmem:[%s1288_s23 + $0xc0] sm:$0xff] %vm636_vm1, %v598_v36 }
 0x1b4   : > { %v885_v37 = vpop.f32.mrb[10].mxu0  ;;  %v909_v38 = vpop.f32.mrb[10].mxu1 }
 0x1b5   : > { %v533_v39 = vadd.f32 %v885_v37, %v1283_v60  ;;  %v613_v40 = vadd.f32 %v909_v38, %v1283_v60  ;;  %v527_v41 = vpop.f32.mrb[11].mxu0  ;;  %v607_v42 = vpop.f32.mrb[11].mxu1 }
 0x1b6   : > { %v528_v43 = vadd.f32 %v1283_v60, %v527_v41  ;;  %v608_v44 = vadd.f32 %v1283_v60, %v607_v42 }
 0x1b7   : > { %648 = vst.msk [vmem:[%s1288_s23 + $0x58] sm:$0xff] %vm636_vm1, %v533_v39  ;;  %664 = vst.msk [vmem:[%s1288_s23 + $0xd8] sm:$0xff] %vm636_vm1, %v613_v40 }
 0x1b8   : > { %647 = vst.msk [vmem:[%s1288_s23 + $0x50] sm:$0xff] %vm636_vm1, %v528_v43  ;;  %663 = vst.msk [vmem:[%s1288_s23 + $0xd0] sm:$0xff] %vm636_vm1, %v608_v44 }
 0x1bc   : > { %v888_v45 = vpop.f32.mrb[12].mxu0  ;;  %v912_v46 = vpop.f32.mrb[12].mxu1 }
 0x1bd   : > { %v543_v47 = vadd.f32 %v888_v45, %v1283_v60  ;;  %v623_v48 = vadd.f32 %v912_v46, %v1283_v60  ;;  %v537_v49 = vpop.f32.mrb[13].mxu0  ;;  %v617_v50 = vpop.f32.mrb[13].mxu1 }
 0x1be   : > { %v538_v51 = vadd.f32 %v1283_v60, %v537_v49  ;;  %v618_v52 = vadd.f32 %v1283_v60, %v617_v50 }
 0x1bf   : > { %650 = vst.msk [vmem:[%s1288_s23 + $0x68] sm:$0xff] %vm636_vm1, %v543_v47  ;;  %666 = vst.msk [vmem:[%s1288_s23 + $0xe8] sm:$0xff] %vm636_vm1, %v623_v48 }
 0x1c0   : > { %649 = vst.msk [vmem:[%s1288_s23 + $0x60] sm:$0xff] %vm636_vm1, %v538_v51  ;;  %665 = vst.msk [vmem:[%s1288_s23 + $0xe0] sm:$0xff] %vm636_vm1, %v618_v52 }
 0x1c4   : > { %v891_v53 = vpop.f32.mrb[14].mxu0  ;;  %v915_v54 = vpop.f32.mrb[14].mxu1 }
 0x1c5   : > { %v553_v55 = vadd.f32 %v891_v53, %v1283_v60  ;;  %v633_v56 = vadd.f32 %v915_v54, %v1283_v60  ;;  %v547_v57 = vpop.f32.mrb[15].mxu0  ;;  %v627_v58 = vpop.f32.mrb[15].mxu1 }
 0x1c6   : > { %v548_v59 = vadd.f32 %v1283_v60, %v547_v57  ;;  %v628_v61 = vadd.f32 %v1283_v60, %v627_v58 }
 0x1c7   : > { %652 = vst.msk [vmem:[%s1288_s23 + $0x78] sm:$0xff] %vm636_vm1, %v553_v55  ;;  %668 = vst.msk [vmem:[%s1288_s23 + $0xf8] sm:$0xff] %vm636_vm1, %v633_v56 }
 0x1c8   : > { %651 = vst.msk [vmem:[%s1288_s23 + $0x70] sm:$0xff] %vm636_vm1, %v548_v59  ;;  %667 = vst.msk [vmem:[%s1288_s23 + $0xf0] sm:$0xff] %vm636_vm1, %v628_v61 }
 0x1c9 PF: > { %s16_s17 = sadd.s32 1, %s1078_s17   ;;  %s1411_s12 = smov %s1062_s13 }
 0x1ca   : > { %p13_p9 = scmp.ge.s32.totalorder %s16_s17, 4   ;;  %s1412_s13 = smov %s1066_s14 }
 0x1cb   : > { %s1413_s14 = smov %s1152_s24  ;;  %s1414_s15 = smov %s1074_s16 }
 0x1cc   : > { %s1415_s16 = smov %s1417_s19  ;;  %15 = sbr.rel (!%p13_p9) target bundleno = 4 (0x4), region = 72 }
 0x1d3   :  { %699 = vsyncpa [#allocation3], 1 }
 0x1d4   :  { %701 = vsyncpa [#allocation3 + $0x1], 1 }

</bundles_post_ra>
